<compile_context>
chip_gen: v6e
topology: v6e:2x2x1
jax: 0.10.0
libtpu: 0.0.40
codegen_flags: <defaults>
</compile_context>

<pallas_src>
import jax
import jax.numpy as jnp
from jax.experimental import pallas as pl
from jax.experimental.pallas import tpu as pltpu

B, D_IN, HIDDEN = 2, 16, 32

# Packed-parameter slab layout: (_SLAB_ROWS, HIDDEN) f32, sections sublane(8)-aligned.
_W1_R0 = 0                     # w1: rows [0, 16)
_B1_R = 16                     # b1: row 16            (rows 17..23 zero pad)
_W2_R0 = 24                    # w2: rows [24, 56)
_B2_R = 56                     # b2: row 56            (rows 57..63 zero pad)
_SLAB_ROWS = 64

_INT32_MAX = jnp.iinfo(jnp.int32).max


def _mlp_argmax_kernel(obs_ref, params_ref, out_ref):
    x = obs_ref[...]                                            # (B, D_IN) f32

    # Static slices of the packed parameter slab (cheap VMEM views, one DMA'd input).
    w1 = params_ref[_W1_R0:_W1_R0 + D_IN, :]                    # (D_IN, H)
    b1 = params_ref[_B1_R:_B1_R + 1, :]                         # (1, H)
    w2 = params_ref[_W2_R0:_W2_R0 + HIDDEN, :]                  # (H, H)
    b2 = params_ref[_B2_R:_B2_R + 1, :]                         # (1, H)

    h1 = jnp.dot(x, w1, preferred_element_type=jnp.float32)     # (B, H)
    h1 = jnp.maximum(h1 + b1, 0.0)                              # ReLU
    h2 = jnp.dot(h1, w2, preferred_element_type=jnp.float32)    # (B, H)
    h2 = jnp.maximum(h2 + b2, 0.0)                              # ReLU

    # Global argmax over the flattened (B, H) latent, first-occurrence tie-break
    # (same as torch.argmax on the flattened tensor).  NaNs are treated as maximal
    # (torch.argmax propagates NaN as the max), so a NaN latent returns its own index.
    rows = jax.lax.broadcasted_iota(jnp.int32, h2.shape, 0)
    cols = jax.lax.broadcasted_iota(jnp.int32, h2.shape, 1)
    flat_idx = rows * h2.shape[1] + cols
    keyed = jnp.where(jnp.isnan(h2), jnp.inf, h2)
    m = jnp.max(keyed)
    out_ref[0, 0] = jnp.min(jnp.where(keyed == m, flat_idx, _INT32_MAX))


def pack_params(w1, b1, w2, b2):
    """Pack (w1, b1, w2, b2) into a single (64, HIDDEN) f32 slab (done once, off the hot path)."""
    slab = jnp.zeros((_SLAB_ROWS, HIDDEN), jnp.float32)
    slab = slab.at[_W1_R0:_W1_R0 + D_IN, :].set(w1)
    slab = slab.at[_B1_R:_B1_R + 1, :].set(b1.reshape(1, HIDDEN))
    slab = slab.at[_W2_R0:_W2_R0 + HIDDEN, :].set(w2)
    slab = slab.at[_B2_R:_B2_R + 1, :].set(b2.reshape(1, HIDDEN))
    return slab


@jax.jit
def onnxable_policy_forward(obs, packed_params):
    """Returns a scalar int32 = argmax of the flattened latent_pi(obs)."""
    out = pl.pallas_call(
        _mlp_argmax_kernel,
        out_shape=jax.ShapeDtypeStruct((1, 1), jnp.int32),
        in_specs=[
            pl.BlockSpec(memory_space=pltpu.MemorySpace.VMEM),  # obs    (B, D_IN)
            pl.BlockSpec(memory_space=pltpu.MemorySpace.VMEM),  # params (64, H) slab
        ],
        out_specs=pl.BlockSpec(memory_space=pltpu.MemorySpace.SMEM),
    )(obs, packed_params)
    # Fused into the same jitted program -> no extra host-side dispatch.
    return out[0, 0]


def _reference(obs, w1, b1, w2, b2):
    h1 = jnp.maximum(obs @ w1 + b1, 0.0)
    h2 = jnp.maximum(h1 @ w2 + b2, 0.0)
    return jnp.argmax(h2).astype(jnp.int32)  # torch.argmax flattens when dim=None


if __name__ == "__main__":
    key = jax.random.PRNGKey(0)
    k_obs, k_w1, k_b1, k_w2, k_b2 = jax.random.split(key, 5)

    # Deterministic synthetic parameters (Kaiming-ish scale), input observation.
    obs = jax.random.normal(k_obs, (B, D_IN), dtype=jnp.float32)
    w1 = jax.random.normal(k_w1, (D_IN, HIDDEN), dtype=jnp.float32) * (1.0 / D_IN ** 0.5)
    b1 = jax.random.normal(k_b1, (1, HIDDEN), dtype=jnp.float32) * 0.1
    w2 = jax.random.normal(k_w2, (HIDDEN, HIDDEN), dtype=jnp.float32) * (1.0 / HIDDEN ** 0.5)
    b2 = jax.random.normal(k_b2, (1, HIDDEN), dtype=jnp.float32) * 0.1

    params = pack_params(w1, b1, w2, b2)   # one-time packing, off the per-call path

    out = onnxable_policy_forward(obs, params)
    out = jax.block_until_ready(out)

    ref = _reference(obs, w1, b1, w2, b2)
    assert int(out) == int(ref), f"mismatch: kernel={int(out)} ref={int(ref)}"

    print("KERNEL_OK")
</pallas_src>

<mosaic_0001>
module attributes {stable_mosaic.version = 11 : i64} {
  func.func @_mlp_argmax_kernel(%arg0: memref<2x16xf32, #tpu.memory_space<vmem>>, %arg1: memref<64x32xf32, #tpu.memory_space<vmem>>, %arg2: memref<1x1xi32, #tpu.memory_space<smem>>) attributes {dimension_semantics = [], scalar_prefetch = 0 : i64, scratch_operands = 0 : i64, tpu.core_type = #tpu.core_type<tc>} {
    %c0 = arith.constant 0 : index
    %c0_0 = arith.constant 0 : index
    %0 = vector.load %arg0[%c0, %c0_0] : memref<2x16xf32, #tpu.memory_space<vmem>>, vector<2x16xf32>
    %c0_1 = arith.constant 0 : index
    %c0_2 = arith.constant 0 : index
    %1 = vector.load %arg1[%c0_1, %c0_2] : memref<64x32xf32, #tpu.memory_space<vmem>>, vector<16x32xf32>
    %c16 = arith.constant 16 : index
    %c0_3 = arith.constant 0 : index
    %2 = vector.load %arg1[%c16, %c0_3] : memref<64x32xf32, #tpu.memory_space<vmem>>, vector<1x32xf32>
    %c24 = arith.constant 24 : index
    %c0_4 = arith.constant 0 : index
    %3 = vector.load %arg1[%c24, %c0_4] : memref<64x32xf32, #tpu.memory_space<vmem>>, vector<32x32xf32>
    %c56 = arith.constant 56 : index
    %c0_5 = arith.constant 0 : index
    %4 = vector.load %arg1[%c56, %c0_5] : memref<64x32xf32, #tpu.memory_space<vmem>>, vector<1x32xf32>
    %cst = arith.constant dense<0.000000e+00> : vector<2x32xf32>
    %5 = tpu.matmul %0, %1, %cst {dimension_numbers = #tpu.dot_dimension_numbers<[1], [0], [0], [1], [0, 0, 1, 1], [], []>} : vector<2x16xf32>, vector<16x32xf32>, vector<2x32xf32> -> vector<2x32xf32>
    %6 = vector.broadcast %2 : vector<1x32xf32> to vector<2x32xf32>
    %7 = arith.addf %5, %6 : vector<2x32xf32>
    %cst_6 = arith.constant 0.000000e+00 : f32
    %8 = vector.broadcast %cst_6 : f32 to vector<2x32xf32>
    %9 = arith.maximumf %7, %8 : vector<2x32xf32>
    %cst_7 = arith.constant dense<0.000000e+00> : vector<2x32xf32>
    %10 = tpu.matmul %9, %3, %cst_7 {dimension_numbers = #tpu.dot_dimension_numbers<[1], [0], [0], [1], [0, 0, 1, 1], [], []>} : vector<2x32xf32>, vector<32x32xf32>, vector<2x32xf32> -> vector<2x32xf32>
    %11 = vector.broadcast %4 : vector<1x32xf32> to vector<2x32xf32>
    %12 = arith.addf %10, %11 : vector<2x32xf32>
    %cst_8 = arith.constant 0.000000e+00 : f32
    %13 = vector.broadcast %cst_8 : f32 to vector<2x32xf32>
    %14 = arith.maximumf %12, %13 : vector<2x32xf32>
    %15 = tpu.iota {dimensions = array<i32: 0>} : vector<2x32xi32>
    %16 = tpu.iota {dimensions = array<i32: 1>} : vector<2x32xi32>
    %c32_i32 = arith.constant 32 : i32
    %17 = vector.broadcast %c32_i32 : i32 to vector<2x32xi32>
    %18 = arith.muli %15, %17 : vector<2x32xi32>
    %19 = arith.addi %18, %16 : vector<2x32xi32>
    %20 = arith.cmpf one, %14, %14 : vector<2x32xf32>
    %cst_9 = arith.constant 0x7F800000 : f32
    %21 = vector.broadcast %cst_9 : f32 to vector<2x32xf32>
    %22 = arith.select %20, %21, %14 : vector<2x32xi1>, vector<2x32xf32>
    %23 = vector.shape_cast %22 : vector<2x32xf32> to vector<1x2x32xf32>
    %cst_10 = arith.constant dense<0xFF800000> : vector<1xf32>
    %24 = vector.multi_reduction <maximumf>, %23, %cst_10 [1, 2] : vector<1x2x32xf32> to vector<1xf32>
    %25 = vector.shape_cast %24 : vector<1xf32> to vector<1x1x1xf32>
    %26 = vector.extract %25[0, 0, 0] : f32 from vector<1x1x1xf32>
    %27 = vector.broadcast %26 : f32 to vector<2x32xf32>
    %28 = arith.cmpf oeq, %22, %27 : vector<2x32xf32>
    %c2147483647_i32 = arith.constant 2147483647 : i32
    %29 = vector.broadcast %c2147483647_i32 : i32 to vector<2x32xi32>
    %30 = arith.select %28, %19, %29 : vector<2x32xi1>, vector<2x32xi32>
    %31 = vector.shape_cast %30 : vector<2x32xi32> to vector<1x2x32xi32>
    %cst_11 = arith.constant dense<2147483647> : vector<1xi32>
    %32 = vector.multi_reduction <minsi>, %31, %cst_11 [1, 2] : vector<1x2x32xi32> to vector<1xi32>
    %33 = vector.shape_cast %32 : vector<1xi32> to vector<1x1x1xi32>
    %34 = vector.extract %33[0, 0, 0] : i32 from vector<1x1x1xi32>
    %c0_12 = arith.constant 0 : index
    %c0_13 = arith.constant 0 : index
    %35 = memref.load %arg2[%c0_12, %c0_13] : memref<1x1xi32, #tpu.memory_space<smem>>
    memref.store %34, %arg2[%c0_12, %c0_13] : memref<1x1xi32, #tpu.memory_space<smem>>
    return
  }
}

</mosaic_0001>

<bundles_post_ra>
// kernel: onnxable_policy_forward.1
= control target key start
LH: loop header
LB: loop body
LE: loop exit
PB: predicated region body
PF: predicated region fallthrough
CT: control target
= control target key end

     0   :  { %v288_v1 = vmov 0.0   ;;  %vm289_vm0 = vmmov 0   ;;  %s338_s0 = inlined_call_operand.vmem [shape: f32[2,16], index: 0, kind: input, shape index: {}]   ;;  %s339_s1 = inlined_call_operand.vmem [shape: f32[64,32], index: 1, kind: input, shape index: {}]   ;;  %s340_s2 = inlined_call_operand.hbm [shape: s32[1,1], index: 2, kind: output, shape index: {}]  }
   0x1   :  { %v14_v0 = vld [vmem:[%s339_s1 + $0x8] sm:$0xff]  ;;  %253 = vmatprep.subr.mxu0 %v288_v1  ;;  %v13_v2 = vld [vmem:[%s339_s1] sm:$0xff]  ;;  %257 = vmatprep.mubr.msk.f32.mxu0 %vm289_vm0, %v288_v1  ;;  %v19_v3 = vld [vmem:[%s339_s1 + $0x30] sm:$0xff] }
   0x2   :  { %7 = vsyncpa [#allocation3], 0  ;;  %254 = vmatpush3.msra.mxu0 %v14_v0  ;;  %v12_v4 = vld [vmem:[%s338_s0] sm:$0x3]  ;;  %vm25_vm1 = vcmask 130048   ;;  %260 = vmatprep.subr.mxu1 %v288_v1  ;;  %v18_v5 = vld [vmem:[%s339_s1 + $0x28] sm:$0xff]  ;;  %v179_v27 = vlaneseq }
   0x3   :  { %255 = vmatprep.subr.mxu0 %v288_v1  ;;  %261 = vmatpush3.msra.mxu1 %v19_v3  ;;  %v17_v6 = vld [vmem:[%s339_s1 + $0x20] sm:$0xff]  ;;  %v16_v7 = vld [vmem:[%s339_s1 + $0x18] sm:$0xff]  ;;  %v241_v8 = vld [vmem:[%s339_s1 + $0x10] ss:$0 sm:$0xff]  ;;  %vm104_vm2 = vcmask 261120   ;;  %vm187_vm3 = vcmask 254976  }
   0x4   :  { %256 = vmatpush3.msra.mxu0 %v13_v2  ;;  %262 = vmatprep.subr.mxu1 %v288_v1  ;;  %v243_v13 = vld [vmem:[%s339_s1 + $0x38] ss:$0 sm:$0xff]  ;;  %v180_v28 = vshrl.u32 %v179_v27, 7  ;;  %v182_v29 = vand.u32 127, %v179_v27  ;;  %s290_s27 = smov [#allocation2]  }
   0x5   :  { %258 = vmatmul.mubr.msk.f32.vlgmr.msra.gmra.mxu0 %vm25_vm1, %v12_v4  ;;  %268 = vmatprep.mubr.msk.f32.mxu1 %vm289_vm0, %v288_v1 }
   0x6   :  { %263 = vmatpush3.msra.mxu1 %v18_v5  ;;  %v183_v30 = vmul.u32 32, %v180_v28 }
   0x7   :  { %264 = vmatprep.subr.mxu1 %v288_v1 }
   0x8   :  { %265 = vmatpush3.msra.mxu1 %v17_v6  ;;  %v184_v31 = vadd.s32 %v183_v30, %v182_v29 }
   0x9   :  { %266 = vmatprep.subr.mxu1 %v288_v1 }
   0xa   :  { %267 = vmatpush3.msra.mxu1 %v16_v7 }
  0xc5   :  { %v95_v9 = vpop.f32.mrf.mxu0 }
  0xc6   :  { %v96_v10 = vadd.f32 %v241_v8, %v95_v9 }
  0xc7   :  { %v259_v11 = vpop.f32.mrf.mxu0 }
  0xc8   :  { %v99_v12 = vmax.f32 %v96_v10, 0.0 }
  0xca   :  { %269 = vmatmul.mubr.msk.f32.vlgmr.msra.gmra.mxu1 %vm104_vm2, %v99_v12 }
 0x18a   :  { %v174_v14 = vpop.f32.mrf.mxu1 }
 0x18b   :  { %v175_v15 = vadd.f32 %v243_v13, %v174_v14 }
 0x18c   :  { %v270_v16 = vpop.f32.mrf.mxu1 }
 0x18d   :  { %v178_v17 = vmax.f32 %v175_v15, 0.0 }
 0x18f   :  { %vm185_vm4 = vcmp.ne.f32.partialorder %v178_v17, %v178_v17 }
 0x190   :  { %v186_v18 = vsel %vm185_vm4, inf, %v178_v17 }
 0x191   :  { %v188_v19 = vsel %vm187_vm3, %v186_v18, -inf }
 0x192   :  { %189 = vmax.xlane.f32.xlu0 %v188_v19 }
 0x21b   :  { %v190_v20 = vpop.xlane.xlu0 %189 }
 0x21c   :  { %v191_v21 = vrot.slane %v190_v20, 4 }
 0x21e   :  { %v192_v22 = vmax.f32 %v190_v20, %v191_v21 }
 0x220   :  { %v193_v23 = vrot.slane %v192_v22, 2 }
 0x222   :  { %v194_v24 = vmax.f32 %v192_v22, %v193_v23 }
 0x224   :  { %v195_v25 = vrot.slane %v194_v24, 1 }
 0x226   :  { %v196_v26 = vmax.f32 %v194_v24, %v195_v25 }
 0x228   :  { %271 = vpush %v196_v26 }
 0x259   :  { %s272_s1 = spop %271 }
 0x25a   :  { %v198_v32 = vstv %s272_s1 }
 0x25b   :  { %vm199_vm5 = vcmp.eq.f32.partialorder %v186_v18, %v198_v32 }
 0x25c   :  { %v200_v33 = vsel %vm199_vm5, %v184_v31, 2147483647 }
 0x25d   :  { %v201_v34 = vsel %vm187_vm3, %v200_v33, 2147483647 }
 0x25e   :  { %v203_v35 = vshra.s32 %v201_v34, 16  ;;  %v202_v37 = vand.u32 65535, %v201_v34 }
 0x260   :  { %v205_v36 = vcvt.s32.f32 %v203_v35  ;;  %v204_v39 = vcvt.s32.f32 %v202_v37 }
 0x262   :  { %206 = vmin.xlane.f32.xlu0 %v205_v36 }
 0x2eb   :  { %v207_v38 = vpop.xlane.xlu0 %206 }
 0x2ec   :  { %vm208_vm6 = vcmp.eq.f32.partialorder %v205_v36, %v207_v38  ;;  %v213_v41 = vcvt.f32.s32 %v207_v38 }
 0x2ed   :  { %v209_v40 = vsel %vm208_vm6, %v204_v39, inf }
 0x2ee   :  { %210 = vmin.xlane.f32.xlu1 %v209_v40  ;;  %v214_v43 = vshll.u32 %v213_v41, 16 }
 0x377   :  { %v211_v42 = vpop.xlane.xlu1 %210 }
 0x378   :  { %v212_v44 = vcvt.f32.s32 %v211_v42 }
 0x37a   :  { %v215_v45 = vadd.s32 %v214_v43, %v212_v44 }
 0x37c   :  { %v216_v46 = vrot.slane %v215_v45, 4 }
 0x37e   :  { %vm217_vm7 = vcmp.lt.s32.totalorder %v215_v45, %v216_v46 }
 0x37f   :  { %v218_v47 = vsel %vm217_vm7, %v215_v45, %v216_v46 }
 0x380   :  { %v219_v48 = vrot.slane %v218_v47, 2 }
 0x382   :  { %vm220_vm8 = vcmp.lt.s32.totalorder %v218_v47, %v219_v48 }
 0x383   :  { %v221_v49 = vsel %vm220_vm8, %v218_v47, %v219_v48 }
 0x384   :  { %v222_v50 = vrot.slane %v221_v49, 1 }
 0x386   :  { %vm223_vm9 = vcmp.lt.s32.totalorder %v221_v49, %v222_v50 }
 0x387   :  { %v224_v51 = vsel %vm223_vm9, %v221_v49, %v222_v50 }
 0x388   :  { %273 = vpush %v224_v51 }
 0x3b9   :  { %s274_s26 = spop %273 }
 0x3ba   :  { %227 = sst [smem:[#allocation2]] %s274_s26 }
 0x3bb   :  { %235 = dma.smem_to_hbm %s290_s27, 16, %s340_s2, [#allocation3]  }
 0x3bc   :  { %286 = dma.done.wait [#allocation3], 16  }
 0x3bd   :  { %287 = vsyncadd [#allocation3], 4294967280 }
 0x3be   :  { %239 = sfence }
 0x3bf   :  { %240 = vsyncpa [#allocation3], 1 }

</bundles_post_ra>
